<compile_context>
chip_gen: v5e
topology: v5e:2x2
jax: 0.10.0
libtpu: 0.0.40
codegen_flags: <defaults>
</compile_context>

<pallas_src>
import functools

import jax
import jax.numpy as jnp
from jax.experimental import pallas as pl
from jax.experimental.pallas import tpu as pltpu

ACT_DTYPE = jnp.bfloat16   # activation / MXU-input dtype (accumulation is always f32)


def _device_kind():
    try:
        return jax.devices()[0].device_kind.lower()
    except Exception:
        return ""


_KIND = _device_kind()
_IS_V5 = "v5" in _KIND
_IS_V7 = "v7" in _KIND
# v7x has 64 MiB physical VMEM (32 MiB scoped default) -> cap at 48 MiB; v5e/v6e have
# 128 MiB physical -> 64 MiB is comfortable headroom.
_VMEM_LIMIT = (48 << 20) if _IS_V7 else (64 << 20)
_TM_CAP = 128 if _IS_V5 else 256     # feed the 256x256 MXU on v6e/v7x
_TN_CAP = 256 if _IS_V5 else 512
_TK_CAP = 1024


def _ceil_to(x, m):
    return ((x + m - 1) // m) * m


def _pick_tile(dim, cap, align):
    """Largest legal tile <= cap.

    Full dim if it fits; otherwise the largest `align`-multiple divisor of `dim`
    (so no padding is needed); otherwise an aligned cap (caller pads as fallback).
    """
    if dim <= cap:
        return dim
    best = None
    t = align
    while t <= cap:
        if dim % t == 0:
            best = t
        t += align
    if best is not None:
        return best
    return max(cap - (cap % align), align)


# ----------------------------------------------------------------------------
# Tiled matmul + bias (+ optional activation)
# ----------------------------------------------------------------------------

def _matmul_bias_kernel(x_ref, w_ref, b_ref, o_ref, acc_ref, *, activation):
    @pl.when(pl.program_id(2) == 0)
    def _():
        acc_ref[...] = jnp.zeros_like(acc_ref)

    acc_ref[...] += jnp.dot(x_ref[...], w_ref[...],
                            preferred_element_type=jnp.float32)

    @pl.when(pl.program_id(2) == pl.num_programs(2) - 1)
    def _():
        y = acc_ref[...] + b_ref[...].astype(jnp.float32)
        if activation == "gelu":
            # TODO(synk): HF BERT default gelu is the exact erf form; tanh approx used here.
            y = jax.nn.gelu(y, approximate=True)
        elif activation == "relu":
            y = jnp.maximum(y, 0.0)
        o_ref[...] = y.astype(o_ref.dtype)


def matmul_bias(x, w, b, activation="none", out_dtype=None):
    """y = x @ w + b (+ optional activation).  x:(M,K) w:(K,N) b:(N,).

    Tiled over (M, N, K) with an f32 VMEM accumulator; K is the (arbitrary)
    reduction grid axis; M/N axes are parallel (megacore shardable).  Tile sizes
    are divisors of the real dims, so activations are not padded (padding only
    remains as a fallback for awkward dims).
    """
    M, K = x.shape
    K2, N = w.shape
    assert K == K2
    if out_dtype is None:
        out_dtype = x.dtype
    if x.dtype != w.dtype:
        x = x.astype(w.dtype)

    tm = _pick_tile(M, _TM_CAP, 8)
    tn = _pick_tile(N, _TN_CAP, 128)
    tk = _pick_tile(K, _TK_CAP, 128)
    Mp, Np, Kp = _ceil_to(M, tm), _ceil_to(N, tn), _ceil_to(K, tk)
    if (Mp, Kp) != (M, K):              # fallback only; divisor picking avoids this
        x = jnp.pad(x, ((0, Mp - M), (0, Kp - K)))
    if (Kp, Np) != (K, N):
        w = jnp.pad(w, ((0, Kp - K), (0, Np - N)))
    b2 = b.reshape(1, N)
    if Np != N:
        b2 = jnp.pad(b2, ((0, 0), (0, Np - N)))

    out = pl.pallas_call(
        functools.partial(_matmul_bias_kernel, activation=activation),
        out_shape=jax.ShapeDtypeStruct((Mp, Np), out_dtype),
        grid=(Mp // tm, Np // tn, Kp // tk),
        in_specs=[
            pl.BlockSpec((tm, tk), lambda i, j, k: (i, k)),
            pl.BlockSpec((tk, tn), lambda i, j, k: (k, j)),
            pl.BlockSpec((1, tn), lambda i, j, k: (0, j)),
        ],
        out_specs=pl.BlockSpec((tm, tn), lambda i, j, k: (i, j)),
        scratch_shapes=[pltpu.VMEM((tm, tn), jnp.float32)],
        compiler_params=pltpu.CompilerParams(
            dimension_semantics=("parallel", "parallel", "arbitrary"),
            vmem_limit_bytes=_VMEM_LIMIT),
    )(x, w, b2)
    if (Mp, Np) != (M, N):
        out = out[:M, :N]
    return out


# ----------------------------------------------------------------------------
# Fused: matmul + bias + residual add + LayerNorm (projection epilogue)
# ----------------------------------------------------------------------------

def _matmul_res_ln_kernel(x_ref, w_ref, b_ref, r_ref, g_ref, bb_ref, o_ref,
                          acc_ref, *, eps):
    @pl.when(pl.program_id(1) == 0)
    def _():
        acc_ref[...] = jnp.zeros_like(acc_ref)

    acc_ref[...] += jnp.dot(x_ref[...], w_ref[...],
                            preferred_element_type=jnp.float32)

    @pl.when(pl.program_id(1) == pl.num_programs(1) - 1)
    def _():
        y = (acc_ref[...] + b_ref[...].astype(jnp.float32)
             + r_ref[...].astype(jnp.float32))
        mu = jnp.mean(y, axis=-1, keepdims=True)
        var = jnp.maximum(jnp.mean(y * y, axis=-1, keepdims=True) - mu * mu, 0.0)
        yn = (y - mu) * jax.lax.rsqrt(var + eps)
        yn = yn * g_ref[...].astype(jnp.float32) + bb_ref[...].astype(jnp.float32)
        o_ref[...] = yn.astype(o_ref.dtype)


def matmul_bias_residual_ln(x, w, b, residual, gamma, beta, eps=1e-12,
                            out_dtype=ACT_DTYPE):
    """LayerNorm(x @ w + b + residual) with gamma/beta.  x:(M,K) w:(K,N) rest:(M,N)/(N,).

    The output tile is the full N (=hidden) width so the last-K epilogue sees
    complete rows and can do the Add&Norm in-register -> saves one full (M,N)
    HBM write + read per Add&Norm compared to a separate LayerNorm kernel.
    """
    M, K = x.shape
    K2, N = w.shape
    assert K == K2 and residual.shape == (M, N)
    if x.dtype != w.dtype:
        x = x.astype(w.dtype)

    tm = _pick_tile(M, _TM_CAP, 8)
    tk = _pick_tile(K, _TK_CAP, 128)
    Mp, Kp = _ceil_to(M, tm), _ceil_to(K, tk)
    if (Mp, Kp) != (M, K):              # fallback only
        x = jnp.pad(x, ((0, Mp - M), (0, Kp - K)))
    if Kp != K:
        w = jnp.pad(w, ((0, Kp - K), (0, 0)))
    if Mp != M:
        residual = jnp.pad(residual, ((0, Mp - M), (0, 0)))

    out = pl.pallas_call(
        functools.partial(_matmul_res_ln_kernel, eps=eps),
        out_shape=jax.ShapeDtypeStruct((Mp, N), out_dtype),
        grid=(Mp // tm, Kp // tk),
        in_specs=[
            pl.BlockSpec((tm, tk), lambda i, k: (i, k)),
            pl.BlockSpec((tk, N), lambda i, k: (k, 0)),
            pl.BlockSpec((1, N), lambda i, k: (0, 0)),
            pl.BlockSpec((tm, N), lambda i, k: (i, 0)),
            pl.BlockSpec((1, N), lambda i, k: (0, 0)),
            pl.BlockSpec((1, N), lambda i, k: (0, 0)),
        ],
        out_specs=pl.BlockSpec((tm, N), lambda i, k: (i, 0)),
        scratch_shapes=[pltpu.VMEM((tm, N), jnp.float32)],
        compiler_params=pltpu.CompilerParams(
            dimension_semantics=("parallel", "arbitrary"),
            vmem_limit_bytes=_VMEM_LIMIT),
    )(x, w, b.reshape(1, N), residual, gamma.reshape(1, N), beta.reshape(1, N))
    if Mp != M:
        out = out[:M]
    return out


# ----------------------------------------------------------------------------
# Standalone LayerNorm (embeddings), row-tiled, one-pass variance
# ----------------------------------------------------------------------------

def _layernorm_kernel(x_ref, g_ref, b_ref, o_ref, *, eps):
    x = x_ref[...].astype(jnp.float32)
    mu = jnp.mean(x, axis=-1, keepdims=True)
    var = jnp.maximum(jnp.mean(x * x, axis=-1, keepdims=True) - mu * mu, 0.0)
    y = (x - mu) * jax.lax.rsqrt(var + eps)
    y = y * g_ref[...].astype(jnp.float32) + b_ref[...].astype(jnp.float32)
    o_ref[...] = y.astype(o_ref.dtype)


def layernorm(x, g, b, eps=1e-12, out_dtype=None, tm_cap=512):
    """LayerNorm(x) over the last dim.  x: (M, H)."""
    M, H = x.shape
    if out_dtype is None:
        out_dtype = x.dtype
    tm = _pick_tile(M, tm_cap, 8)
    Mp = _ceil_to(M, tm)
    if Mp != M:                          # fallback only
        x = jnp.pad(x, ((0, Mp - M), (0, 0)))

    row_spec = pl.BlockSpec((tm, H), lambda i: (i, 0))
    vec_spec = pl.BlockSpec((1, H), lambda i: (0, 0))
    out = pl.pallas_call(
        functools.partial(_layernorm_kernel, eps=eps),
        out_shape=jax.ShapeDtypeStruct((Mp, H), out_dtype),
        grid=(Mp // tm,),
        in_specs=[row_spec, vec_spec, vec_spec],
        out_specs=row_spec,
        compiler_params=pltpu.CompilerParams(
            dimension_semantics=("parallel",),
            vmem_limit_bytes=_VMEM_LIMIT),
    )(x, g.reshape(1, H), b.reshape(1, H))
    if Mp != M:
        out = out[:M]
    return out


# ----------------------------------------------------------------------------
# Multi-head self-attention on the fused QKV tensor
# ----------------------------------------------------------------------------

def _attention_kernel(qkv_ref, o_ref, *, num_heads, scale, tq):
    qi = pl.program_id(1)
    qkv = qkv_ref[0]                               # (S, 3H) bf16, columns [Q | K | V]
    S = qkv.shape[0]
    H = qkv.shape[-1] // 3
    dh = H // num_heads
    if tq == S:
        q_rows = qkv
    else:
        q_rows = qkv_ref[0, pl.ds(qi * tq, tq), :]
    outs = []
    for h in range(num_heads):                     # heads are static lane slices of QKV
        q = q_rows[:, h * dh:(h + 1) * dh]
        k = qkv[:, H + h * dh:H + (h + 1) * dh]
        v = qkv[:, 2 * H + h * dh:2 * H + (h + 1) * dh]
        s = jax.lax.dot_general(q, k, (((1,), (1,)), ((), ())),
                                preferred_element_type=jnp.float32) * scale
        s = s - jnp.max(s, axis=-1, keepdims=True)
        e = jnp.exp(s)
        p = e * pl.reciprocal(jnp.sum(e, axis=-1, keepdims=True), approx=True)
        outs.append(jnp.dot(p.astype(v.dtype), v, preferred_element_type=jnp.float32))
    # Lane-dense store: concatenate heads and write the full (tq, H) slab once.
    o_ref[0] = jnp.concatenate(outs, axis=-1).astype(o_ref.dtype)


def attention(qkv, num_heads):
    """Softmax(QK^T/sqrt(dh))V per head.  qkv: (B, S, 3H) -> (B, S, H).

    Head split/merge is done by in-kernel lane slicing of the fused QKV block
    (no HBM-round-trip transposes); per-head outputs are concatenated so the
    output store is one lane-dense (tq, H) slab.  A query-tile grid axis gives
    megacore parallelism.  No attention mask (the reference forward passes none).
    TODO(synk): for long sequences (v7x VMEM), tile KV flash-style with online
                softmax instead of materializing the full (S, S) scores per head.
    """
    B, S, threeH = qkv.shape
    H = threeH // 3
    dh = H // num_heads
    scale = 1.0 / float(dh) ** 0.5
    tq = _pick_tile(S, 256, 8)
    if S % tq != 0:
        tq = S
    return pl.pallas_call(
        functools.partial(_attention_kernel, num_heads=num_heads, scale=scale, tq=tq),
        out_shape=jax.ShapeDtypeStruct((B, S, H), qkv.dtype),
        grid=(B, S // tq),
        in_specs=[pl.BlockSpec((1, S, threeH), lambda b, qi: (b, 0, 0))],
        out_specs=pl.BlockSpec((1, tq, H), lambda b, qi: (b, qi, 0)),
        compiler_params=pltpu.CompilerParams(
            dimension_semantics=("parallel", "parallel"),
            vmem_limit_bytes=_VMEM_LIMIT),
    )(qkv)


# ----------------------------------------------------------------------------
# Mean over sequence, batch-tiled
# ----------------------------------------------------------------------------

def _mean_seq_kernel(x_ref, o_ref):
    o_ref[...] = jnp.mean(x_ref[...].astype(jnp.float32), axis=1,
                          keepdims=True).astype(o_ref.dtype)


def mean_over_seq(x, out_dtype=jnp.float32):
    """torch.mean(x, dim=1): (B, S, H) -> (B, H)."""
    B, S, H = x.shape
    out = pl.pallas_call(
        _mean_seq_kernel,
        out_shape=jax.ShapeDtypeStruct((B, 1, H), out_dtype),
        grid=(B,),
        in_specs=[pl.BlockSpec((1, S, H), lambda b: (b, 0, 0))],
        out_specs=pl.BlockSpec((1, 1, H), lambda b: (b, 0, 0)),
        compiler_params=pltpu.CompilerParams(
            dimension_semantics=("parallel",),
            vmem_limit_bytes=_VMEM_LIMIT),
    )(x)
    return out.reshape(B, H)


# ----------------------------------------------------------------------------
# Conv1d(same) + folded BatchNorm1d(eval) + ReLU  (tiny head; one call per layer)
# ----------------------------------------------------------------------------

def _conv1d_bias_relu_kernel(x_ref, w_ref, b_ref, o_ref, *, K, L, B):
    for bi in range(B):                                   # B tiny: static unroll
        xp = x_ref[bi]                                    # (C_in, L + K - 1), zero-padded
        acc = jnp.zeros(o_ref.shape[1:], jnp.float32)     # (C_out, L)
        for k in range(K):                                # static unroll over taps
            acc = acc + jnp.dot(w_ref[k], xp[:, k:k + L],
                                preferred_element_type=jnp.float32)
        y = acc + b_ref[...].astype(jnp.float32)          # conv bias (BN already folded)
        o_ref[bi] = jnp.maximum(y, 0.0).astype(o_ref.dtype)


def conv1d_bn_relu(x, w, b, bn_scale, bn_shift):
    """Conv1d(padding='same', stride=1, odd K) + BatchNorm1d(eval) + ReLU.

    Eval-mode BN is folded into the conv weights/bias on the wrapper side (tiny
    one-time cost), so the kernel only adds a single bias vector.  All batch rows
    are processed in one grid step: the head is microscopic, so per-step launch
    overhead would dominate a per-batch grid.
    """
    B, C_in, L = x.shape
    C_out, _, K = w.shape
    w_eff = w * bn_scale[:, None, None]
    b_eff = (b * bn_scale + bn_shift).reshape(C_out, 1)
    pad_l = (K - 1) // 2
    pad_r = (K - 1) - pad_l
    xp = jnp.pad(x, ((0, 0), (0, 0), (pad_l, pad_r)))
    Lp = L + K - 1
    wk = jnp.transpose(w_eff, (2, 0, 1))  # (K, C_out, C_in): taps on the leading axis
    return pl.pallas_call(
        functools.partial(_conv1d_bias_relu_kernel, K=K, L=L, B=B),
        out_shape=jax.ShapeDtypeStruct((B, C_out, L), x.dtype),
        grid=(1,),
        in_specs=[
            pl.BlockSpec((B, C_in, Lp), lambda i: (0, 0, 0)),
            pl.BlockSpec((K, C_out, C_in), lambda i: (0, 0, 0)),
            pl.BlockSpec((C_out, 1), lambda i: (0, 0)),
        ],
        out_specs=pl.BlockSpec((B, C_out, L), lambda i: (0, 0, 0)),
        compiler_params=pltpu.CompilerParams(vmem_limit_bytes=_VMEM_LIMIT),
    )(xp, wk, b_eff)


# ----------------------------------------------------------------------------
# Parameter initialization (deterministic, synthetic)
# ----------------------------------------------------------------------------

def _normal(key, shape, scale=0.02, dtype=jnp.float32):
    return (scale * jax.random.normal(key, shape)).astype(dtype)


def init_blue_bert(key, *, vocab, max_pos, hidden, num_heads, ffn, n_layers,
                   num_kernels, kernel_sizes):
    keys = iter(jax.random.split(key, 512))
    nk = lambda: next(keys)
    p = {
        "tok_emb": _normal(nk(), (vocab, hidden)),
        "pos_emb": _normal(nk(), (max_pos, hidden)),
        "typ_emb": _normal(nk(), (2, hidden)),
        "emb_ln_g": jnp.ones((hidden,), jnp.float32),
        "emb_ln_b": jnp.zeros((hidden,), jnp.float32),
        "num_heads": num_heads,
        "layers": [],
        "cnns": [],
    }
    wdt = ACT_DTYPE   # bf16 MXU weights; biases / LN params stay f32
    for _ in range(n_layers):
        layer = {
            # fused Q|K|V projection: one (H, 3H) matmul instead of three (H, H)
            "w_qkv": _normal(nk(), (hidden, 3 * hidden), dtype=wdt),
            "b_qkv": _normal(nk(), (3 * hidden,)),
            "wo": _normal(nk(), (hidden, hidden), dtype=wdt),
            "bo": _normal(nk(), (hidden,)),
            "ln1_g": jnp.ones((hidden,), jnp.float32),
            "ln1_b": jnp.zeros((hidden,), jnp.float32),
            "w1": _normal(nk(), (hidden, ffn), dtype=wdt),
            "b1": _normal(nk(), (ffn,)),
            "w2": _normal(nk(), (ffn, hidden), dtype=wdt),
            "b2": _normal(nk(), (hidden,)),
            "ln2_g": jnp.ones((hidden,), jnp.float32),
            "ln2_b": jnp.zeros((hidden,), jnp.float32),
        }
        p["layers"].append(layer)

    # CNN head (f32, microscopic).
    # TODO(synk): BatchNorm uses eval-mode running stats (mean=0, var=1, PyTorch default).
    bn_eps = 1e-5
    in_ch = 1
    for nker, ksize in zip(num_kernels, kernel_sizes):
        gamma = 1.0 + _normal(nk(), (nker,), 0.1)
        beta = _normal(nk(), (nker,), 0.1)
        running_mean = jnp.zeros((nker,), jnp.float32)
        running_var = jnp.ones((nker,), jnp.float32)
        bn_scale = gamma * jax.lax.rsqrt(running_var + bn_eps)
        bn_shift = beta - running_mean * bn_scale
        p["cnns"].append({
            "w": _normal(nk(), (nker, in_ch, ksize), 0.1),
            "b": _normal(nk(), (nker,), 0.1),
            "bn_scale": bn_scale,
            "bn_shift": bn_shift,
        })
        in_ch = nker

    # AvgPool1d(NumKernels[-1]) + Flatten + Linear(dim, 1): done in plain JAX.
    pool_k = num_kernels[-1]
    c_last = num_kernels[-1]
    lk = hidden // pool_k
    assert c_last * lk == hidden, "hidden dim must be divisible by NumKernels[-1]"
    p["pool_k"] = pool_k
    p["w_lin"] = _normal(nk(), (hidden, 1), 0.1)    # == PyTorch linear1.weight.T
    p["b_lin"] = _normal(nk(), (1,), 0.1)
    return p


# ----------------------------------------------------------------------------
# Forward pass
# ----------------------------------------------------------------------------

def bert_encoder(p, input_ids, token_type_ids):
    B, S = input_ids.shape
    H = p["tok_emb"].shape[1]
    nH = p["num_heads"]

    # Embedding gathers stay in plain JAX (data-dependent gather; tiny).
    emb = (jnp.take(p["tok_emb"], input_ids, axis=0)
           + p["pos_emb"][:S][None, :, :]
           + jnp.take(p["typ_emb"], token_type_ids, axis=0))
    # TODO(synk): residual stream is carried in bf16 for bandwidth; fp32 PyTorch
    #             reference will differ by accumulated rounding.
    x = layernorm(emb.reshape(B * S, H), p["emb_ln_g"], p["emb_ln_b"],
                  out_dtype=ACT_DTYPE)

    for layer in p["layers"]:
        qkv = matmul_bias(x, layer["w_qkv"], layer["b_qkv"])        # (B*S, 3H)
        a = attention(qkv.reshape(B, S, 3 * H), nH)                 # (B, S, H)
        # wo projection with fused residual-add + LayerNorm epilogue
        x = matmul_bias_residual_ln(a.reshape(B * S, H), layer["wo"], layer["bo"],
                                    residual=x, gamma=layer["ln1_g"], beta=layer["ln1_b"])
        h = matmul_bias(x, layer["w1"], layer["b1"], activation="gelu")
        # w2 projection with fused residual-add + LayerNorm epilogue
        x = matmul_bias_residual_ln(h, layer["w2"], layer["b2"],
                                    residual=x, gamma=layer["ln2_g"], beta=layer["ln2_b"])
    return x.reshape(B, S, H)


def blue_bert_forward(p, input_ids, token_type_ids):
    B = input_ids.shape[0]
    dim = p["tok_emb"].shape[1]

    hs = bert_encoder(p, input_ids, token_type_ids)        # x = model(...)[0]    (B, S, dim)
    x = mean_over_seq(hs, out_dtype=jnp.float32)           # torch.mean(x, dim=1) (B, dim)
    x = x.reshape(B, 1, dim)                               # x.view(-1, 1, dim)   (B, 1, dim)

    # CNN stack: [Conv1d, BN, ReLU], [Dropout(eval=id), Conv1d, BN, ReLU], ...
    for conv in p["cnns"]:
        x = conv1d_bn_relu(x, conv["w"], conv["b"], conv["bn_scale"], conv["bn_shift"])

    # AvgPool1d(NumKernels[-1]) + Flatten + Linear(dim, 1): microscopic -> plain JAX.
    pool_k = p["pool_k"]
    B_, C_last, L = x.shape
    lk = L // pool_k
    xp = x[:, :, :lk * pool_k].reshape(B_, C_last, lk, pool_k).mean(axis=-1)
    xf = xp.reshape(B_, C_last * lk)                       # channel-major flatten == torch
    out = xf @ p["w_lin"] + p["b_lin"]
    return out


# ----------------------------------------------------------------------------
# Main
# ----------------------------------------------------------------------------

if __name__ == "__main__":
    B, S = 2, 8
    HIDDEN = 32          # config.hidden_size (self.dim), small synthetic value
    VOCAB = 32
    NUM_KERNELS = [8, 4]
    KERNEL_SIZES = [5, 3]

    root = jax.random.PRNGKey(0)
    k_params, k_ids = jax.random.split(root)

    params = init_blue_bert(
        k_params, vocab=VOCAB, max_pos=S, hidden=HIDDEN, num_heads=4, ffn=64,
        n_layers=2, num_kernels=NUM_KERNELS, kernel_sizes=KERNEL_SIZES)

    input_ids = jax.random.randint(k_ids, (B, S), 0, VOCAB, dtype=jnp.int32)
    token_type_ids = jnp.zeros((B, S), dtype=jnp.int32)

    out = blue_bert_forward(params, input_ids, token_type_ids)
    out = jax.block_until_ready(out)
    assert out.shape == (B, 1), out.shape
    assert bool(jnp.all(jnp.isfinite(out)))
    print("KERNEL_OK")
</pallas_src>

<mosaic_0001>
module attributes {stable_mosaic.version = 11 : i64} {
  func.func @_layernorm_kernel(%arg0: i32, %arg1: memref<16x32xf32, #tpu.memory_space<vmem>>, %arg2: memref<1x32xf32, #tpu.memory_space<vmem>>, %arg3: memref<1x32xf32, #tpu.memory_space<vmem>>, %arg4: memref<16x32xbf16, #tpu.memory_space<vmem>>) attributes {dimension_semantics = [#tpu.dimension_semantics<parallel>], iteration_bounds = array<i64: 1>, scalar_prefetch = 0 : i64, scratch_operands = 0 : i64, tpu.core_type = #tpu.core_type<tc>, window_params = [{transform_indices = @transform_0, window_bounds = array<i64: 16, 32>}, {pipeline_mode = #tpu.pipeline_mode<synchronous>, transform_indices = @transform_1, window_bounds = array<i64: 1, 32>}, {pipeline_mode = #tpu.pipeline_mode<synchronous>, transform_indices = @transform_2, window_bounds = array<i64: 1, 32>}, {transform_indices = @transform_3, window_bounds = array<i64: 16, 32>}]} {
    %c0 = arith.constant 0 : index
    %c0_0 = arith.constant 0 : index
    %0 = vector.load %arg1[%c0, %c0_0] : memref<16x32xf32, #tpu.memory_space<vmem>>, vector<16x32xf32>
    %cst = arith.constant dense<0.000000e+00> : vector<16xf32>
    %1 = vector.multi_reduction <add>, %0, %cst [1] : vector<16x32xf32> to vector<16xf32>
    %2 = vector.shape_cast %1 : vector<16xf32> to vector<16x1xf32>
    %cst_1 = arith.constant 3.200000e+01 : f32
    %3 = vector.broadcast %cst_1 : f32 to vector<16x1xf32>
    %4 = arith.divf %2, %3 : vector<16x1xf32>
    %5 = arith.mulf %0, %0 : vector<16x32xf32>
    %cst_2 = arith.constant dense<0.000000e+00> : vector<16xf32>
    %6 = vector.multi_reduction <add>, %5, %cst_2 [1] : vector<16x32xf32> to vector<16xf32>
    %7 = vector.shape_cast %6 : vector<16xf32> to vector<16x1xf32>
    %cst_3 = arith.constant 3.200000e+01 : f32
    %8 = vector.broadcast %cst_3 : f32 to vector<16x1xf32>
    %9 = arith.divf %7, %8 : vector<16x1xf32>
    %10 = arith.mulf %4, %4 : vector<16x1xf32>
    %11 = arith.subf %9, %10 : vector<16x1xf32>
    %cst_4 = arith.constant 0.000000e+00 : f32
    %12 = vector.broadcast %cst_4 : f32 to vector<16x1xf32>
    %13 = arith.maximumf %11, %12 : vector<16x1xf32>
    %14 = vector.broadcast %4 : vector<16x1xf32> to vector<16x32xf32>
    %15 = arith.subf %0, %14 : vector<16x32xf32>
    %cst_5 = arith.constant 9.99999996E-13 : f32
    %16 = vector.broadcast %cst_5 : f32 to vector<16x1xf32>
    %17 = arith.addf %13, %16 : vector<16x1xf32>
    %18 = math.rsqrt %17 : vector<16x1xf32>
    %19 = vector.broadcast %18 : vector<16x1xf32> to vector<16x32xf32>
    %20 = arith.mulf %15, %19 : vector<16x32xf32>
    %c0_6 = arith.constant 0 : index
    %c0_7 = arith.constant 0 : index
    %21 = vector.load %arg2[%c0_6, %c0_7] : memref<1x32xf32, #tpu.memory_space<vmem>>, vector<1x32xf32>
    %22 = vector.broadcast %21 : vector<1x32xf32> to vector<16x32xf32>
    %23 = arith.mulf %20, %22 : vector<16x32xf32>
    %c0_8 = arith.constant 0 : index
    %c0_9 = arith.constant 0 : index
    %24 = vector.load %arg3[%c0_8, %c0_9] : memref<1x32xf32, #tpu.memory_space<vmem>>, vector<1x32xf32>
    %25 = vector.broadcast %24 : vector<1x32xf32> to vector<16x32xf32>
    %26 = arith.addf %23, %25 : vector<16x32xf32>
    %27 = arith.truncf %26 : vector<16x32xf32> to vector<16x32xbf16>
    %c0_10 = arith.constant 0 : index
    %c0_11 = arith.constant 0 : index
    %28 = vector.load %arg4[%c0_10, %c0_11] : memref<16x32xbf16, #tpu.memory_space<vmem>>, vector<16x32xbf16>
    tpu.vector_store %arg4[%c0_10, %c0_11], %27 {strides = array<i32>} : memref<16x32xbf16, #tpu.memory_space<vmem>>, vector<16x32xbf16>,
    return
  }
  func.func @transform_0(%arg0: i32) -> (i32, i32) {
    %c0_i32 = arith.constant 0 : i32
    %c0_i32_0 = arith.constant 0 : i32
    return %arg0, %c0_i32 : i32, i32
  }
  func.func @transform_1(%arg0: i32) -> (i32, i32) {
    %c0_i32 = arith.constant 0 : i32
    %c0_i32_0 = arith.constant 0 : i32
    %c0_i32_1 = arith.constant 0 : i32
    return %c0_i32, %c0_i32_0 : i32, i32
  }
  func.func @transform_2(%arg0: i32) -> (i32, i32) {
    %c0_i32 = arith.constant 0 : i32
    %c0_i32_0 = arith.constant 0 : i32
    %c0_i32_1 = arith.constant 0 : i32
    return %c0_i32, %c0_i32_0 : i32, i32
  }
  func.func @transform_3(%arg0: i32) -> (i32, i32) {
    %c0_i32 = arith.constant 0 : i32
    %c0_i32_0 = arith.constant 0 : i32
    return %arg0, %c0_i32 : i32, i32
  }
}

</mosaic_0001>

<bundles_post_ra>
// kernel: tpu_custom_call.1
= control target key start
LH: loop header
LB: loop body
LE: loop exit
PB: predicated region body
PF: predicated region fallthrough
CT: control target
= control target key end

     0   :  { %8 = vsyncpa [#allocation3], 0  ;;  %s284_s0 = inlined_call_operand.hbm [shape: f32[16,32], index: 0, kind: input, shape index: {}]   ;;  %s285_s1 = inlined_call_operand.hbm [shape: f32[1,32], index: 1, kind: input, shape index: {}]   ;;  %s286_s2 = inlined_call_operand.vmem [shape: f32[1,32], index: 2, kind: input, shape index: {}]   ;;  %s287_s3 = inlined_call_operand.hbm [shape: bf16[16,32], index: 3, kind: output, shape index: {}]  }
   0x1   :  { %9 = vsyncpa [#allocation6], 0 }
   0x2   :  { %10 = vsyncpa [#allocation4], 0  ;;  %s15_s14 = sshll.u32 %s284_s0, 4  ;;  %s236_s15 = smov [#allocation2]   ;;  %s16_s14 = int_to_ptr.hbm [resolvable:$true] %s15_s14 }
   0x3   :  { %s17_s16 = sshll.u32 %s236_s15, 4  ;;  %s29_s19 = sshll.u32 %s285_s1, 4  ;;  %s18_s16 = int_to_ptr.vmem [resolvable:$true] %s17_s16  ;;  %s30_s19 = int_to_ptr.hbm [resolvable:$true] %s29_s19 }
   0x4   :  { %s237_s20 = smov 128   ;;  %s238_s21 = smov 8  }
   0x5   :  { %23 = dma.hbm_to_vmem [thread:$0]  %s16_s14, 256, %s18_s16, [#allocation3], %s237_s20, %s237_s20, %s238_s21  }
   0x6   :  { %s239_s22 = smov [#allocation5]  }
   0x7   :  { %s31_s23 = sshll.u32 %s239_s22, 4  ;;  %s32_s23 = int_to_ptr.vmem [resolvable:$true] %s31_s23 }
   0x8   :  { %34 = dma.hbm_to_vmem [thread:$0]  %s30_s19, 16, %s32_s23, [#allocation6]  }
   0x9   :  { %230 = dma.done.wait [#allocation3], 256  }
   0xa   :  { %231 = vsyncadd [#allocation3], 4294967040 }
   0xb   :  { %232 = dma.done.wait [#allocation6], 16  }
   0xc   :  { %233 = vsyncadd [#allocation6], 4294967280  ;;  %vm47_vm0 = vcmask 261120   ;;  %v45_v0 = vld [vmem:[#allocation2] sm:$0xff]  ;;  %v270_v3 = vld [vmem:[#allocation2 + $0x8] sm:$0xff]  ;;  %v240_v8 = vmov 32.0  }
   0xd   :  { %v48_v1 = vsel %vm47_vm0, %v45_v0, 0.0  ;;  %v63_v2 = vmul.f32 %v45_v0, %v45_v0  ;;  %v64_v5 = vmul.f32 %v270_v3, %v270_v3  ;;  %v51_v6 = vsel %vm47_vm0, %v270_v3, 0.0  ;;  %v150_v39 = vld [vmem:[#allocation5] ss:$0 sm:$0xff]  ;;  %v151_v42 = vld [vmem:[%s286_s2] ss:$0 sm:$0xff] }
   0xe   :  { %49 = vadd.xlane.f32.xlu0 %v48_v1  ;;  %152 = vrcp.f32 %v240_v8  ;;  %vm119_vm6 = vcmask 257024   ;;  %s241_s2 = smov [#allocation7]   ;;  %s128_s27 = sshll.u32 %s287_s3, 4  ;;  %s129_s27 = int_to_ptr.hbm [resolvable:$true] %s128_s27 }
   0xf   :  { %v65_v4 = vsel %vm47_vm0, %v63_v2, 0.0  ;;  %v68_v7 = vsel %vm47_vm0, %v64_v5, 0.0  ;;  %s126_s24 = sshll.u32 %s241_s2, 4  ;;  %s242_s28 = smov 64   ;;  %s127_s24 = int_to_ptr.vmem [resolvable:$true] %s126_s24 }
  0x10   :  { %66 = vadd.xlane.f32.xlu1 %v65_v4  ;;  %s243_s29 = smov 4  }
  0x14   :  { %v153_v9 = vpop.eup %152 }
  0x15   :  { %v55_v10 = vmul.f32 32.0, %v153_v9  ;;  %vm59_vm1 = vweird.f32 %v153_v9 }
  0x16   :  { %52 = vadd.xlane.f32.xlu0 %v51_v6 }
  0x17   :  { %v56_v11 = vsub.f32 1.0, %v55_v10 }
  0x18   :  { %69 = vadd.xlane.f32.xlu1 %v68_v7 }
  0x19   :  { %v57_v12 = vmul.f32 %v153_v9, %v56_v11 }
  0x1b   :  { %v58_v13 = vadd.f32 %v153_v9, %v57_v12 }
  0x1d   :  { %v60_v14 = vsel %vm59_vm1, %v153_v9, %v58_v13 }
  0x81   :  { %v50_v15 = vpop.xlane.xlu0 %49 }
  0x82   :  { %v61_v16 = vmul.f32 %v60_v14, %v50_v15 }
  0x83   :  { %v67_v17 = vpop.xlane.xlu1 %66 }
  0x84   :  { %v73_v18 = vmul.f32 %v61_v16, %v61_v16  ;;  %v71_v19 = vmul.f32 %v67_v17, %v60_v14  ;;  %v79_v38 = vsub.f32 %v45_v0, %v61_v16 }
  0x86   :  { %v75_v20 = vsub.f32 %v71_v19, %v73_v18 }
  0x88   :  { %v77_v21 = vmax.f32 %v75_v20, 0.0 }
  0x89   :  { %v53_v22 = vpop.xlane.xlu0 %52 }
  0x8a   :  { %v81_v23 = vadd.f32 1e-12, %v77_v21  ;;  %v62_v24 = vmul.f32 %v60_v14, %v53_v22 }
  0x8b   :  { %v70_v25 = vpop.xlane.xlu1 %69 }
  0x8c   :  { %154 = vrsqrt.f32 %v81_v23  ;;  %v74_v26 = vmul.f32 %v62_v24, %v62_v24  ;;  %v72_v27 = vmul.f32 %v70_v25, %v60_v14  ;;  %vm89_vm3 = vweird.f32 %v81_v23 }
  0x8d   :  { %v80_v51 = vsub.f32 %v270_v3, %v62_v24 }
  0x8e   :  { %v76_v28 = vsub.f32 %v72_v27, %v74_v26 }
  0x90   :  { %v78_v29 = vmax.f32 %v76_v28, 0.0 }
  0x92   :  { %v155_v30 = vpop.eup %154  ;;  %v82_v32 = vadd.f32 1e-12, %v78_v29 }
  0x93   :  { %v84_v31 = vmul.f32 %v155_v30, %v81_v23  ;;  %vm90_vm2 = vweird.f32 %v155_v30 }
  0x94   :  { %156 = vrsqrt.f32 %v82_v32  ;;  %vm91_vm4 = vmor %vm89_vm3, %vm90_vm2  ;;  %vm99_vm7 = vweird.f32 %v82_v32 }
  0x95   :  { %v85_v33 = vmul.f32 %v155_v30, %v84_v31 }
  0x97   :  { %v86_v34 = vmul.f32 0.5, %v85_v33 }
  0x99   :  { %v87_v35 = vsub.f32 1.5, %v86_v34 }
  0x9a   :  { %v157_v36 = vpop.eup %156 }
  0x9b   :  { %v88_v37 = vmul.f32 %v155_v30, %v87_v35  ;;  %v94_v40 = vmul.f32 %v157_v36, %v82_v32  ;;  %vm100_vm5 = vweird.f32 %v157_v36 }
  0x9c   :  { %vm101_vm8 = vmor %vm99_vm7, %vm100_vm5 }
  0x9d   :  { %v92_v41 = vsel %vm91_vm4, %v155_v30, %v88_v37  ;;  %v95_v44 = vmul.f32 %v157_v36, %v94_v40 }
  0x9e   :  { %v103_v43 = vmul.f32 %v92_v41, %v79_v38 }
  0x9f   :  { %v96_v46 = vmul.f32 0.5, %v95_v44 }
  0xa0   :  { %v109_v45 = vmul.f32 %v150_v39, %v103_v43 }
  0xa1   :  { %v97_v48 = vsub.f32 1.5, %v96_v46 }
  0xa2   :  { %v115_v47 = vadd.f32 %v151_v42, %v109_v45 }
  0xa3   :  { %v98_v49 = vmul.f32 %v157_v36, %v97_v48 }
  0xa4   :  { %v117_v50 = vpack.c.bf16 %v115_v47, %v115_v47 }
  0xa5   :  { %v102_v52 = vsel %vm101_vm8, %v157_v36, %v98_v49 }
  0xa6   :  { %120 = vst.msk [vmem:[#allocation7] sm:$0xf] %vm119_vm6, %v117_v50  ;;  %v104_v53 = vmul.f32 %v102_v52, %v80_v51 }
  0xa8   :  { %v110_v54 = vmul.f32 %v150_v39, %v104_v53 }
  0xaa   :  { %v116_v55 = vadd.f32 %v151_v42, %v110_v54 }
  0xac   :  { %v118_v56 = vpack.c.bf16 %v116_v55, %v116_v55 }
  0xae   :  { %121 = vst.msk [vmem:[#allocation7 + $0x4] sm:$0xf] %vm119_vm6, %v118_v56 }
  0xaf   :  { %134 = dma.vmem_to_hbm [thread:$0]  %s127_s24, 128, %s129_s27, [#allocation4], %s242_s28, %s242_s28, %s243_s29  }
  0xb0   :  { %234 = dma.done.wait [#allocation4], 128  }
  0xb1   :  { %235 = vsyncadd [#allocation4], 4294967168 }
  0xb2   :  { %139 = vsyncpa [#allocation3], 1 }
  0xb3   :  { %140 = vsyncpa [#allocation6], 1 }
  0xb4   :  { %141 = vsyncpa [#allocation4], 1 }

</bundles_post_ra>
